<compile_context>
chip_gen: v6e
topology: v6e:2x2x1
jax: 0.10.0
libtpu: 0.0.40
codegen_flags: <defaults>
</compile_context>

<pallas_src>
import functools
import math

import jax
import jax.numpy as jnp
from jax import lax
from jax.experimental import pallas as pl
from jax.experimental.pallas import tpu as pltpu

LN_EPS = 1e-5       # torch.nn.LayerNorm default
NEG_SLOPE = 0.2     # GATConv LeakyReLU default
NEG_INF = -1e30


def _round_up(x, m):
    return (x + m - 1) // m * m


def _gat_block_kernel(h_ref, a_src_ref, a_dst_ref, adj_ref, bias_ref,
                      gamma_ref, beta_ref, *rest, heads, fout_pad, fout,
                      residual):
    # h_ref:     [N_pad, heads*Fout_pad]  resident projected features
    # a_src_ref: [8, N_pad]               per-node source attention logits (row hd)
    # a_dst_ref: [TILE_N, 128]            per-node dest attention logits (lane hd)
    # adj_ref:   [TILE_N, N_pad] int8     adj[i, j] = 1 iff edge j -> i (+ self loops)
    # bias_ref:  [1, heads*Fout_pad]      GATConv bias (per-head blocks)
    # gamma/beta:[1, Fout_pad]            LayerNorm(output_dim) affine params
    # rest:      ([x_tile,] o_tile)       residual input tile (optional), output tile
    if residual:
        x_ref, o_ref = rest
    else:
        (o_ref,) = rest

    # Hoisted once per row tile; reused by every head.
    neg_mask = jnp.where(adj_ref[...].astype(jnp.float32) > 0.0, 0.0, NEG_INF)
    lane_valid = (lax.broadcasted_iota(jnp.int32, (1, fout_pad), 1) < fout
                  ).astype(jnp.float32)
    a_dst_all = a_dst_ref[...]
    gamma = gamma_ref[...]
    beta = beta_ref[...]
    inv_fout = 1.0 / float(fout)

    # heads is small & static; each head writes straight into its o_ref slice,
    # so no cross-head intermediates stay live and no concat is materialized.
    for hd in range(heads):
        xh = h_ref[:, hd * fout_pad:(hd + 1) * fout_pad]          # [N, Fp]
        a_s = a_src_ref[hd:hd + 1, :]                             # [1, N]
        a_d = a_dst_all[:, hd:hd + 1]                             # [T, 1]

        # logits[i, j] = a_dst[i] + a_src[j]  (message j -> i), LeakyReLU, mask.
        logits = a_d + a_s                                        # [T, N]
        logits = jnp.where(logits >= 0.0, logits, NEG_SLOPE * logits)
        logits = logits + neg_mask
        m = jnp.max(logits, axis=-1, keepdims=True)
        p = jnp.exp(logits - m)
        denom = jnp.sum(p, axis=-1, keepdims=True)

        # Un-normalized aggregation on the MXU (bf16 operands, f32 accumulate),
        # then a single deferred reciprocal scale on the [T, Fp] result.
        # TODO(synk): eval mode only — GATConv attention dropout not applied.
        agg = jnp.dot(p.astype(jnp.bfloat16), xh.astype(jnp.bfloat16),
                      preferred_element_type=jnp.float32)          # [T, Fp]
        agg = agg * pl.reciprocal(denom, approx=True)
        y = agg + bias_ref[:, hd * fout_pad:(hd + 1) * fout_pad]

        # LayerNorm(output_dim) on this head's real lanes (padded lanes are 0).
        # Two-pass variance for precision; lane_valid zeroes the padded lanes
        # after mean subtraction.
        mean = jnp.sum(y, axis=-1, keepdims=True) * inv_fout
        yc = (y - mean) * lane_valid
        var = jnp.sum(yc * yc, axis=-1, keepdims=True) * inv_fout
        y = yc * lax.rsqrt(var + LN_EPS) * gamma + beta

        # act = Identity()  (module: `if last_act: self.act = Identity()`)
        # Dropout: identity in eval mode.
        if residual:
            y = y + x_ref[:, hd * fout_pad:(hd + 1) * fout_pad]
        o_ref[:, hd * fout_pad:(hd + 1) * fout_pad] = y.astype(o_ref.dtype)


def init_conv_block_params(key, input_dim, output_dim, heads):
    """Deterministic params mirroring GATConv + LayerNorm(output_dim) shapes."""
    k1, k2, k3 = jax.random.split(key, 3)
    s_w = math.sqrt(6.0 / (input_dim + heads * output_dim))
    w = jax.random.uniform(k1, (input_dim, heads * output_dim), jnp.float32, -s_w, s_w)
    s_a = math.sqrt(6.0 / (1 + output_dim))
    att_src = jax.random.uniform(k2, (heads, output_dim), jnp.float32, -s_a, s_a)
    att_dst = jax.random.uniform(k3, (heads, output_dim), jnp.float32, -s_a, s_a)
    bias = jnp.zeros((heads * output_dim,), jnp.float32)   # GATConv bias
    gamma = jnp.ones((output_dim,), jnp.float32)           # LayerNorm(output_dim) weight
    beta = jnp.zeros((output_dim,), jnp.float32)           # LayerNorm(output_dim) bias
    return dict(w=w, att_src=att_src, att_dst=att_dst, bias=bias, gamma=gamma, beta=beta)


def conv_block_v2_forward(x, edge_index, params, *, heads, residual=False):
    """Eval-mode forward of ConvBlock_v2 (return_attention_weights=False path)."""
    # TODO(synk): return_attention_weights=True branch (per-edge alpha output) not implemented.
    n, fin = x.shape
    fout = params["att_src"].shape[1]
    feat = heads * fout
    assert heads <= 128

    fout_pad = _round_up(fout, 128)
    feat_pad = heads * fout_pad

    # Row-tile size: 256 keeps streamed adj + logits modest even on v7x (64 MiB VMEM).
    tile_n = min(256, _round_up(n, 8))
    n_pad = _round_up(n, tile_n)
    grid = (n_pad // tile_n,)

    # ---- Projection outside the kernel, attention vectors folded into W -------
    w = params["w"]                                           # [fin, heads*fout]
    w3 = w.reshape(fin, heads, fout)
    w_as = jnp.einsum("fhd,hd->fh", w3, params["att_src"])    # [fin, heads]
    w_ad = jnp.einsum("fhd,hd->fh", w3, params["att_dst"])    # [fin, heads]
    w_aug = jnp.concatenate([w, w_as, w_ad], axis=1)          # [fin, feat + 2*heads]
    h_aug = jnp.dot(x, w_aug, preferred_element_type=jnp.float32)
    h = h_aug[:, :feat]                                       # projected features
    a_src = h_aug[:, feat:feat + heads]                       # [n, heads]
    a_dst = h_aug[:, feat + heads:feat + 2 * heads]           # [n, heads]

    # ---- Padded, lane-dense device buffers ------------------------------------
    h_p = jnp.zeros((n_pad, feat_pad), jnp.float32)
    for hd in range(heads):
        h_p = h_p.at[:n, hd * fout_pad:hd * fout_pad + fout].set(
            h[:, hd * fout:(hd + 1) * fout])
    a_src_p = jnp.zeros((8, n_pad), jnp.float32).at[:heads, :n].set(a_src.T)
    a_dst_p = jnp.zeros((n_pad, 128), jnp.float32).at[:n, :heads].set(a_dst)

    bias_p = jnp.zeros((1, feat_pad), jnp.float32)
    for hd in range(heads):
        bias_p = bias_p.at[0, hd * fout_pad:hd * fout_pad + fout].set(
            params["bias"][hd * fout:(hd + 1) * fout])
    gamma_p = jnp.zeros((1, fout_pad), jnp.float32).at[0, :fout].set(params["gamma"])
    beta_p = jnp.zeros((1, fout_pad), jnp.float32).at[0, :fout].set(params["beta"])

    # Dense int8 adjacency with self loops (GATConv default add_self_loops=True).
    # adj[dst, src] = 1 for each edge src -> dst; diagonal set for all padded
    # rows so every softmax row has at least one valid entry.
    src, dst = edge_index[0], edge_index[1]
    adj = jnp.zeros((n_pad, n_pad), jnp.int8)
    adj = adj.at[dst, src].set(1)
    diag = jnp.arange(n_pad)
    adj = adj.at[diag, diag].set(1)

    args = [h_p, a_src_p, a_dst_p, adj, bias_p, gamma_p, beta_p]
    in_specs = [
        pl.BlockSpec((n_pad, feat_pad), lambda i: (0, 0)),    # h (resident)
        pl.BlockSpec((8, n_pad), lambda i: (0, 0)),           # a_src (resident)
        pl.BlockSpec((tile_n, 128), lambda i: (i, 0)),        # a_dst (row tile)
        pl.BlockSpec((tile_n, n_pad), lambda i: (i, 0)),      # adj  (row tile, int8)
        pl.BlockSpec((1, feat_pad), lambda i: (0, 0)),        # bias
        pl.BlockSpec((1, fout_pad), lambda i: (0, 0)),        # gamma
        pl.BlockSpec((1, fout_pad), lambda i: (0, 0)),        # beta
    ]
    if residual:
        assert fin == feat, "residual requires input_dim == heads*output_dim"
        assert heads == 1 or fout % 128 == 0, \
            "residual with heads>1 requires output_dim % 128 == 0 (layout match)"
        x_p = jnp.zeros((n_pad, feat_pad), jnp.float32).at[:n, :fin].set(x)
        args.append(x_p)
        in_specs.append(pl.BlockSpec((tile_n, feat_pad), lambda i: (i, 0)))
    out_specs = pl.BlockSpec((tile_n, feat_pad), lambda i: (i, 0))

    kernel = functools.partial(_gat_block_kernel, heads=heads, fout_pad=fout_pad,
                               fout=fout, residual=residual)

    # VMEM budget: resident buffers + double-buffered streamed tiles + headroom
    # for the [tile_n, n_pad] f32 logits temporaries.  Capped at 64 MiB (v7x safe).
    resident = 4 * (h_p.size + a_src_p.size + bias_p.size + gamma_p.size + beta_p.size)
    streamed = (tile_n * n_pad * 1                    # adj tile (int8)
                + tile_n * 128 * 4                    # a_dst tile
                + tile_n * feat_pad * 4               # out tile
                + (tile_n * feat_pad * 4 if residual else 0))
    working = resident + 2 * streamed + 6 * tile_n * n_pad * 4
    vmem_limit = int(min(64 * 1024 * 1024, max(32 * 1024 * 1024, working)))

    flops = (heads * (2 * n_pad * n_pad * fout_pad      # aggregation matmul
                      + 8 * n_pad * n_pad)              # logits / softmax elementwise
             + heads * 14 * n_pad * fout_pad)           # bias + LayerNorm + scale
    transcendentals = heads * n_pad * n_pad + 2 * heads * n_pad
    bytes_accessed = (adj.size
                      + 4 * (h_p.size + a_src_p.size + a_dst_p.size + bias_p.size
                             + gamma_p.size + beta_p.size + n_pad * feat_pad)
                      + (4 * n_pad * feat_pad if residual else 0))
    cost = pl.CostEstimate(flops=int(flops),
                           transcendentals=int(transcendentals),
                           bytes_accessed=int(bytes_accessed))

    out = pl.pallas_call(
        kernel,
        out_shape=jax.ShapeDtypeStruct((n_pad, feat_pad), jnp.float32),
        grid=grid,
        in_specs=in_specs,
        out_specs=out_specs,
        compiler_params=pltpu.CompilerParams(
            dimension_semantics=("parallel",),
            vmem_limit_bytes=vmem_limit),
        cost_estimate=cost,
    )(*args)

    # Slice the real nodes / real feature columns back out.
    if heads == 1:
        return out[:n, :fout]
    return jnp.concatenate(
        [out[:n, hd * fout_pad:hd * fout_pad + fout] for hd in range(heads)], axis=-1)
    # TODO(synk): genuinely sparse graphs at scale would want a block-sparse
    # (scalar-prefetched nonzero-block) formulation instead of dense [N, N] adjacency.


if __name__ == "__main__":
    # ConvBlock_v2(input_dim=16, output_dim=32, heads=1, dropout=0.5,
    #              norm=LayerNorm, last_act=ReLU, residual=False), eval mode.
    input_dim, output_dim, heads = 16, 32, 1
    num_nodes = 12

    key = jax.random.PRNGKey(0)
    kx, kp = jax.random.split(key)
    x = jax.random.normal(kx, (num_nodes, input_dim), jnp.float32)

    # Deterministic bidirectional ring graph: edge_index[0]=src, edge_index[1]=dst.
    idx = jnp.arange(num_nodes)
    src = jnp.concatenate([idx, (idx + 1) % num_nodes])
    dst = jnp.concatenate([(idx + 1) % num_nodes, idx])
    edge_index = jnp.stack([src, dst], axis=0)

    params = init_conv_block_params(kp, input_dim, output_dim, heads)

    out = conv_block_v2_forward(x, edge_index, params, heads=heads, residual=False)
    jax.block_until_ready(out)
    assert out.shape == (num_nodes, heads * output_dim), out.shape
    assert bool(jnp.all(jnp.isfinite(out)))
    print("KERNEL_OK")
</pallas_src>

<mosaic_0001>
module attributes {stable_mosaic.version = 11 : i64} {
  func.func @_gat_block_kernel(%arg0: i32, %arg1: memref<16x128xf32, #tpu.memory_space<vmem>>, %arg2: memref<8x16xf32, #tpu.memory_space<vmem>>, %arg3: memref<16x128xf32, #tpu.memory_space<vmem>>, %arg4: memref<16x16xi8, #tpu.memory_space<vmem>>, %arg5: memref<1x128xf32, #tpu.memory_space<vmem>>, %arg6: memref<1x128xf32, #tpu.memory_space<vmem>>, %arg7: memref<1x128xf32, #tpu.memory_space<vmem>>, %arg8: memref<16x128xf32, #tpu.memory_space<vmem>>) attributes {dimension_semantics = [#tpu.dimension_semantics<parallel>], iteration_bounds = array<i64: 1>, scalar_prefetch = 0 : i64, scratch_operands = 0 : i64, tpu.core_type = #tpu.core_type<tc>, window_params = [{pipeline_mode = #tpu.pipeline_mode<synchronous>, transform_indices = @transform_0, window_bounds = array<i64: 16, 128>}, {pipeline_mode = #tpu.pipeline_mode<synchronous>, transform_indices = @transform_1, window_bounds = array<i64: 8, 16>}, {transform_indices = @transform_2, window_bounds = array<i64: 16, 128>}, {transform_indices = @transform_3, window_bounds = array<i64: 16, 16>}, {pipeline_mode = #tpu.pipeline_mode<synchronous>, transform_indices = @transform_4, window_bounds = array<i64: 1, 128>}, {pipeline_mode = #tpu.pipeline_mode<synchronous>, transform_indices = @transform_5, window_bounds = array<i64: 1, 128>}, {pipeline_mode = #tpu.pipeline_mode<synchronous>, transform_indices = @transform_6, window_bounds = array<i64: 1, 128>}, {transform_indices = @transform_7, window_bounds = array<i64: 16, 128>}]} {
    %c0 = arith.constant 0 : index
    %c0_0 = arith.constant 0 : index
    %0 = vector.load %arg4[%c0, %c0_0] : memref<16x16xi8, #tpu.memory_space<vmem>>, vector<16x16xi8>
    %1 = arith.sitofp %0 : vector<16x16xi8> to vector<16x16xf32>
    %cst = arith.constant 0.000000e+00 : f32
    %2 = vector.broadcast %cst : f32 to vector<16x16xf32>
    %3 = arith.cmpf ogt, %1, %2 : vector<16x16xf32>
    %cst_1 = arith.constant 0.000000e+00 : f32
    %cst_2 = arith.constant -1.000000e+30 : f32
    %4 = vector.broadcast %cst_1 : f32 to vector<16x16xf32>
    %5 = vector.broadcast %cst_2 : f32 to vector<16x16xf32>
    %6 = arith.select %3, %4, %5 : vector<16x16xi1>, vector<16x16xf32>
    %7 = tpu.iota {dimensions = array<i32: 1>} : vector<1x128xi32>
    %c32_i32 = arith.constant 32 : i32
    %8 = vector.broadcast %c32_i32 : i32 to vector<1x128xi32>
    %9 = arith.cmpi slt, %7, %8 : vector<1x128xi32>
    %10 = arith.extui %9 : vector<1x128xi1> to vector<1x128xi32>
    %11 = arith.sitofp %10 : vector<1x128xi32> to vector<1x128xf32>
    %c0_3 = arith.constant 0 : index
    %c0_4 = arith.constant 0 : index
    %12 = vector.load %arg3[%c0_3, %c0_4] : memref<16x128xf32, #tpu.memory_space<vmem>>, vector<16x128xf32>
    %c0_5 = arith.constant 0 : index
    %c0_6 = arith.constant 0 : index
    %13 = vector.load %arg6[%c0_5, %c0_6] : memref<1x128xf32, #tpu.memory_space<vmem>>, vector<1x128xf32>
    %c0_7 = arith.constant 0 : index
    %c0_8 = arith.constant 0 : index
    %14 = vector.load %arg7[%c0_7, %c0_8] : memref<1x128xf32, #tpu.memory_space<vmem>>, vector<1x128xf32>
    %c0_9 = arith.constant 0 : index
    %c0_10 = arith.constant 0 : index
    %15 = vector.load %arg1[%c0_9, %c0_10] : memref<16x128xf32, #tpu.memory_space<vmem>>, vector<16x128xf32>
    %c0_11 = arith.constant 0 : index
    %c0_12 = arith.constant 0 : index
    %16 = vector.load %arg2[%c0_11, %c0_12] : memref<8x16xf32, #tpu.memory_space<vmem>>, vector<1x16xf32>
    %17 = vector.extract_strided_slice %12 {offsets = [0, 0], sizes = [16, 1], strides = [1, 1]} : vector<16x128xf32> to vector<16x1xf32>
    %18 = vector.broadcast %17 : vector<16x1xf32> to vector<16x16xf32>
    %19 = vector.broadcast %16 : vector<1x16xf32> to vector<16x16xf32>
    %20 = arith.addf %18, %19 : vector<16x16xf32>
    %cst_13 = arith.constant 0.000000e+00 : f32
    %21 = vector.broadcast %cst_13 : f32 to vector<16x16xf32>
    %22 = arith.cmpf oge, %20, %21 : vector<16x16xf32>
    %cst_14 = arith.constant 2.000000e-01 : f32
    %23 = vector.broadcast %cst_14 : f32 to vector<16x16xf32>
    %24 = arith.mulf %23, %20 : vector<16x16xf32>
    %25 = arith.select %22, %20, %24 : vector<16x16xi1>, vector<16x16xf32>
    %26 = arith.addf %25, %6 : vector<16x16xf32>
    %cst_15 = arith.constant dense<0xFF800000> : vector<16xf32>
    %27 = vector.multi_reduction <maximumf>, %26, %cst_15 [1] : vector<16x16xf32> to vector<16xf32>
    %28 = vector.shape_cast %27 : vector<16xf32> to vector<16x1xf32>
    %29 = vector.broadcast %28 : vector<16x1xf32> to vector<16x16xf32>
    %30 = arith.subf %26, %29 : vector<16x16xf32>
    %31 = math.exp %30 : vector<16x16xf32>
    %cst_16 = arith.constant dense<0.000000e+00> : vector<16xf32>
    %32 = vector.multi_reduction <add>, %31, %cst_16 [1] : vector<16x16xf32> to vector<16xf32>
    %33 = vector.shape_cast %32 : vector<16xf32> to vector<16x1xf32>
    %34 = arith.truncf %31 : vector<16x16xf32> to vector<16x16xbf16>
    %35 = arith.truncf %15 : vector<16x128xf32> to vector<16x128xbf16>
    %cst_17 = arith.constant dense<0.000000e+00> : vector<16x128xf32>
    %36 = tpu.matmul %34, %35, %cst_17 {dimension_numbers = #tpu.dot_dimension_numbers<[1], [0], [0], [1], [0, 0, 1, 1], [], []>} : vector<16x16xbf16>, vector<16x128xbf16>, vector<16x128xf32> -> vector<16x128xf32>
    %37 = tpu.reciprocal %33 {approx = true} : vector<16x1xf32> -> vector<16x1xf32>
    %38 = vector.broadcast %37 : vector<16x1xf32> to vector<16x128xf32>
    %39 = arith.mulf %36, %38 : vector<16x128xf32>
    %c0_18 = arith.constant 0 : index
    %c0_19 = arith.constant 0 : index
    %40 = vector.load %arg5[%c0_18, %c0_19] : memref<1x128xf32, #tpu.memory_space<vmem>>, vector<1x128xf32>
    %41 = vector.broadcast %40 : vector<1x128xf32> to vector<16x128xf32>
    %42 = arith.addf %39, %41 : vector<16x128xf32>
    %cst_20 = arith.constant dense<0.000000e+00> : vector<16xf32>
    %43 = vector.multi_reduction <add>, %42, %cst_20 [1] : vector<16x128xf32> to vector<16xf32>
    %44 = vector.shape_cast %43 : vector<16xf32> to vector<16x1xf32>
    %cst_21 = arith.constant 3.125000e-02 : f32
    %45 = vector.broadcast %cst_21 : f32 to vector<16x1xf32>
    %46 = arith.mulf %44, %45 : vector<16x1xf32>
    %47 = vector.broadcast %46 : vector<16x1xf32> to vector<16x128xf32>
    %48 = arith.subf %42, %47 : vector<16x128xf32>
    %49 = vector.broadcast %11 : vector<1x128xf32> to vector<16x128xf32>
    %50 = arith.mulf %48, %49 : vector<16x128xf32>
    %51 = arith.mulf %50, %50 : vector<16x128xf32>
    %cst_22 = arith.constant dense<0.000000e+00> : vector<16xf32>
    %52 = vector.multi_reduction <add>, %51, %cst_22 [1] : vector<16x128xf32> to vector<16xf32>
    %53 = vector.shape_cast %52 : vector<16xf32> to vector<16x1xf32>
    %cst_23 = arith.constant 3.125000e-02 : f32
    %54 = vector.broadcast %cst_23 : f32 to vector<16x1xf32>
    %55 = arith.mulf %53, %54 : vector<16x1xf32>
    %cst_24 = arith.constant 9.99999974E-6 : f32
    %56 = vector.broadcast %cst_24 : f32 to vector<16x1xf32>
    %57 = arith.addf %55, %56 : vector<16x1xf32>
    %58 = math.rsqrt %57 : vector<16x1xf32>
    %59 = vector.broadcast %58 : vector<16x1xf32> to vector<16x128xf32>
    %60 = arith.mulf %50, %59 : vector<16x128xf32>
    %61 = vector.broadcast %13 : vector<1x128xf32> to vector<16x128xf32>
    %62 = arith.mulf %60, %61 : vector<16x128xf32>
    %63 = vector.broadcast %14 : vector<1x128xf32> to vector<16x128xf32>
    %64 = arith.addf %62, %63 : vector<16x128xf32>
    %c0_25 = arith.constant 0 : index
    %c0_26 = arith.constant 0 : index
    %65 = vector.load %arg8[%c0_25, %c0_26] : memref<16x128xf32, #tpu.memory_space<vmem>>, vector<16x128xf32>
    tpu.vector_store %arg8[%c0_25, %c0_26], %64 {strides = array<i32>} : memref<16x128xf32, #tpu.memory_space<vmem>>, vector<16x128xf32>,
    return
  }
  func.func @transform_0(%arg0: i32) -> (i32, i32) {
    %c0_i32 = arith.constant 0 : i32
    %c0_i32_0 = arith.constant 0 : i32
    %c0_i32_1 = arith.constant 0 : i32
    return %c0_i32, %c0_i32_0 : i32, i32
  }
  func.func @transform_1(%arg0: i32) -> (i32, i32) {
    %c0_i32 = arith.constant 0 : i32
    %c0_i32_0 = arith.constant 0 : i32
    %c0_i32_1 = arith.constant 0 : i32
    return %c0_i32, %c0_i32_0 : i32, i32
  }
  func.func @transform_2(%arg0: i32) -> (i32, i32) {
    %c0_i32 = arith.constant 0 : i32
    %c0_i32_0 = arith.constant 0 : i32
    return %arg0, %c0_i32 : i32, i32
  }
  func.func @transform_3(%arg0: i32) -> (i32, i32) {
    %c0_i32 = arith.constant 0 : i32
    %c0_i32_0 = arith.constant 0 : i32
    return %arg0, %c0_i32 : i32, i32
  }
  func.func @transform_4(%arg0: i32) -> (i32, i32) {
    %c0_i32 = arith.constant 0 : i32
    %c0_i32_0 = arith.constant 0 : i32
    %c0_i32_1 = arith.constant 0 : i32
    return %c0_i32, %c0_i32_0 : i32, i32
  }
  func.func @transform_5(%arg0: i32) -> (i32, i32) {
    %c0_i32 = arith.constant 0 : i32
    %c0_i32_0 = arith.constant 0 : i32
    %c0_i32_1 = arith.constant 0 : i32
    return %c0_i32, %c0_i32_0 : i32, i32
  }
  func.func @transform_6(%arg0: i32) -> (i32, i32) {
    %c0_i32 = arith.constant 0 : i32
    %c0_i32_0 = arith.constant 0 : i32
    %c0_i32_1 = arith.constant 0 : i32
    return %c0_i32, %c0_i32_0 : i32, i32
  }
  func.func @transform_7(%arg0: i32) -> (i32, i32) {
    %c0_i32 = arith.constant 0 : i32
    %c0_i32_0 = arith.constant 0 : i32
    return %arg0, %c0_i32 : i32, i32
  }
}

</mosaic_0001>

<bundles_post_ra>
// kernel: tpu_custom_call.1
= control target key start
LH: loop header
LB: loop body
LE: loop exit
PB: predicated region body
PF: predicated region fallthrough
CT: control target
= control target key end

     0   :  { %12 = vsyncpa [#allocation3], 0  ;;  %s466_s0 = inlined_call_operand.hbm [shape: f32[16,128], index: 0, kind: input, shape index: {}]   ;;  %s467_s1 = inlined_call_operand.hbm [shape: f32[8,16], index: 1, kind: input, shape index: {}]   ;;  %s468_s2 = inlined_call_operand.hbm [shape: f32[16,128], index: 2, kind: input, shape index: {}]   ;;  %s469_s3 = inlined_call_operand.vmem [shape: s8[16,16], index: 3, kind: input, shape index: {}]   ;;  %s470_s4 = inlined_call_operand.vmem [shape: f32[1,128], index: 4, kind: input, shape index: {}]   ;;  %s471_s5 = inlined_call_operand.vmem [shape: f32[1,128], index: 5, kind: input, shape index: {}]   ;;  %s472_s6 = inlined_call_operand.vmem [shape: f32[1,128], index: 6, kind: input, shape index: {}]   ;;  %s473_s7 = inlined_call_operand.hbm [shape: f32[16,128], index: 7, kind: output, shape index: {}]  }
   0x1   :  { %13 = vsyncpa [#allocation6], 0 }
   0x2   :  { %14 = vsyncpa [#allocation4], 0  ;;  %s378_s24 = smov [#allocation5]   ;;  %s379_s26 = smov [#allocation2]  }
   0x3   :  { %s33_s25 = sshll.u32 %s378_s24, 4  ;;  %s20_s27 = sshll.u32 %s379_s26, 4  ;;  %s34_s25 = int_to_ptr.vmem [resolvable:$true] %s33_s25  ;;  %s21_s27 = int_to_ptr.vmem [resolvable:$true] %s20_s27 }
   0x4   :  { %s300_s28 = scalar_lea.vmem %s34_s25, 128  ;;  %p305_p1 = scmp.lt.s32.totalorder %s34_s25, %s34_s25 }
   0x5   :  { %p301_p0 = scmp.ne.s32.totalorder %s34_s25, %s300_s28  ;;  %p306_p2 = scmp.lt.s32.totalorder %s300_s28, %s300_s28 }
   0x7   :  { %p307_p3 = por %p306_p2, %p305_p1 }
   0x9   :  { %p308_p4 = pnand %p307_p3, %p301_p0 }
   0xb   :  { %311 = shalt.err (!%p308_p4)
}
   0xc   :  { %36 = dma.hbm_to_vmem [thread:$0]  %s467_s1, 128, %s34_s25, [#allocation6]  }
   0xd   :  { %s320_s8 = scalar_lea.vmem %s21_s27, 256  ;;  %p325_p6 = scmp.lt.s32.totalorder %s21_s27, %s21_s27 }
   0xe   :  { %p321_p5 = scmp.ne.s32.totalorder %s21_s27, %s320_s8  ;;  %p326_p7 = scmp.lt.s32.totalorder %s320_s8, %s320_s8 }
  0x10   :  { %p327_p8 = por %p326_p7, %p325_p6 }
  0x12   :  { %p328_p9 = pnand %p327_p8, %p321_p5 }
  0x14   :  { %331 = shalt.err (!%p328_p9)
}
  0x15   :  { %s380_s9 = smov 128   ;;  %s381_s10 = smov 8  }
  0x16   :  { %26 = dma.hbm_to_vmem [thread:$0]  %s466_s0, 256, %s21_s27, [#allocation3], %s380_s9, %s380_s9, %s381_s10  }
  0x17   :  { %s382_s13 = smov [#allocation7]  }
  0x18   :  { %s42_s14 = sshll.u32 %s382_s13, 4  ;;  %s43_s14 = int_to_ptr.vmem [resolvable:$true] %s42_s14 }
  0x19   :  { %s340_s1 = scalar_lea.vmem %s43_s14, 256  ;;  %p345_p11 = scmp.lt.s32.totalorder %s43_s14, %s43_s14 }
  0x1a   :  { %p341_p10 = scmp.ne.s32.totalorder %s43_s14, %s340_s1  ;;  %p346_p12 = scmp.lt.s32.totalorder %s340_s1, %s340_s1 }
  0x1c   :  { %p347_p13 = por %p346_p12, %p345_p11 }
  0x1e   :  { %p348_p0 = pnand %p347_p13, %p341_p10 }
  0x20   :  { %351 = shalt.err (!%p348_p0)
}
  0x21   :  { %48 = dma.hbm_to_vmem [thread:$0]  %s468_s2, 256, %s43_s14, [#allocation6], %s380_s9, %s380_s9, %s381_s10  }
  0x22   :  { %372 = dma.done.wait [#allocation3], 256  }
  0x23   :  { %373 = vsyncadd [#allocation3], 4294967040 }
  0x24   :  { %374 = dma.done.wait [#allocation6], 384  }
  0x25   :  { %375 = vsyncadd [#allocation6], 4294966912  ;;  %v383_v0 = vmov 0   ;;  %v82_v1 = vld [vmem:[#allocation7] sm:$0xff]  ;;  %v83_v2 = vld [vmem:[#allocation7 + $0x8] sm:$0xff]  ;;  %vm113_vm3 = vcmask 130048   ;;  %v77_v52 = vlaneseq }
  0x26   :  { %279 = vset.pattern.permute.xlu0 %v383_v0  ;;  %v258_v3 = vld [vmem:[%s469_s3] sm:$0xf]   ;;  %v252_v7 = vld [vmem:[#allocation5] ss:$0 sm:$0xff]  ;;  %v384_v12 = vmov -1e+30  }
  0x27   :  { %91 = vperm.xlu0 %279, %v82_v1   ;;  %v259_v4 = vunpack.c.0.s8 %v258_v3  ;;  %v260_v6 = vunpack.c.1.s8 %v258_v3  ;;  %v86_v24 = vld [vmem:[#allocation2] sm:$0xff]  ;;  %v87_v25 = vld [vmem:[#allocation2 + $0x8] sm:$0xff]  ;;  %v385_v27 = vmov 0.0   ;;  %vm386_vm5 = vmmov 0   ;;  %s387_s21 = smov [#allocation8]  }
  0x28   :  { %v133_v26 = vpack.c.bf16 %v87_v25, %v86_v24  ;;  %263 = vmatprep.subr.bf16.mxu0 %v385_v27  ;;  %265 = vmatprep.mubr.msk.bf16.mxu0 %vm386_vm5, %v385_v27  ;;  %v254_v43 = vld [vmem:[%s470_s4] ss:$0 sm:$0xff]  ;;  %v78_v53 = vand.u32 127, %v77_v52  ;;  %s238_s22 = sshll.u32 %s387_s21, 4  ;;  %s239_s22 = int_to_ptr.vmem [resolvable:$true] %s238_s22 }
  0x29   :  { %v71_v5 = vcvt.s32.f32 %v259_v4  ;;  %v72_v9 = vcvt.s32.f32 %v260_v6  ;;  %s352_s23 = scalar_lea.vmem %s239_s22, 256  ;;  %p357_p2 = scmp.lt.s32.totalorder %s239_s22, %s239_s22 }
  0x2a   :  { %264 = vmatpush3.bf16.msra.mxu0 %v133_v26  ;;  %vm79_vm6 = vcmp.lt.s32.totalorder %v78_v53, 32  ;;  %p353_p1 = scmp.ne.s32.totalorder %s239_s22, %s352_s23  ;;  %p358_p3 = scmp.lt.s32.totalorder %s352_s23, %s352_s23 }
  0x2b   :  { %96 = vperm.xlu0 %279, %v83_v2   ;;  %vm73_vm0 = vcmp.gt.f32.partialorder %v71_v5, 0.0  ;;  %vm74_vm2 = vcmp.gt.f32.partialorder %v72_v9, 0.0  ;;  %v251_v56 = vsel %vm79_vm6, 1.0, %v385_v27 }
  0x2c   :  { %v75_v13 = vsel %vm73_vm0, 0.0, %v384_v12  ;;  %v76_v19 = vsel %vm74_vm2, 0.0, %v384_v12  ;;  %p359_p4 = por %p358_p3, %p357_p2 }
  0x2e   :  { %p360_p5 = pnand %p359_p4, %p353_p1 }
  0xa2   :  { %v92_v8 = vpop.permute.xlu0 %91 }
  0xa3   :  { %v103_v10 = vadd.f32 %v252_v7, %v92_v8  ;;  %v255_v8 = vld [vmem:[%s471_s5] ss:$0 sm:$0xff] }
  0xa5   :  { %v107_v11 = vmul.f32 0.2, %v103_v10  ;;  %vm105_vm1 = vcmp.ge.f32.partialorder %v103_v10, 0.0 }
  0xa6   :  { %v97_v14 = vpop.permute.xlu0 %96 }
  0xa7   :  { %v104_v15 = vadd.f32 %v252_v7, %v97_v14  ;;  %v109_v16 = vsel %vm105_vm1, %v103_v10, %v107_v11  ;;  %v256_v10 = vld [vmem:[%s472_s6] ss:$0 sm:$0xff] }
  0xa8   :  { %v111_v17 = vadd.f32 %v109_v16, %v75_v13 }
  0xa9   :  { %vm106_vm4 = vcmp.ge.f32.partialorder %v104_v15, 0.0  ;;  %v108_v18 = vmul.f32 0.2, %v104_v15 }
  0xaa   :  { %v114_v20 = vsel %vm113_vm3, %v111_v17, -inf }
  0xab   :  { %115 = vmax.xlane.f32.xlu1 %v114_v20  ;;  %v110_v21 = vsel %vm106_vm4, %v104_v15, %v108_v18 }
  0xac   :  { %v112_v22 = vadd.f32 %v110_v21, %v76_v19 }
  0xae   :  { %v117_v23 = vsel %vm113_vm3, %v112_v22, -inf }
  0xaf   :  { %118 = vmax.xlane.f32.xlu1 %v117_v23 }
 0x134   :  { %v116_v28 = vpop.xlane.xlu1 %115 }
 0x135   :  { %v120_v29 = vsub.f32 %v111_v17, %v116_v28 }
 0x137   :  { %v122_v30 = vmul.f32 1.442695, %v120_v29 }
 0x138   :  { %v119_v31 = vpop.xlane.xlu1 %118 }
 0x139   :  { %280 = vpow2.f32 %v122_v30  ;;  %v121_v32 = vsub.f32 %v112_v22, %v119_v31 }
 0x13b   :  { %v124_v33 = vmul.f32 1.442695, %v121_v32 }
 0x13d   :  { %282 = vpow2.f32 %v124_v33 }
 0x146   :  { %v281_v34 = vpop.eup %280 }
 0x147   :  { %v126_v35 = vsel %vm113_vm3, %v281_v34, 0.0 }
 0x148   :  { %127 = vadd.xlane.f32.xlu0 %v126_v35 }
 0x14a   :  { %v283_v36 = vpop.eup %282 }
 0x14b   :  { %v129_v37 = vsel %vm113_vm3, %v283_v36, 0.0  ;;  %v132_v38 = vpack.c.bf16 %v283_v36, %v281_v34 }
 0x14c   :  { %130 = vadd.xlane.f32.xlu1 %v129_v37 }
 0x14d   :  { %266 = vmatmul.mubr.msk.bf16.vlgmr.msra.gmra.mxu0 %vm113_vm3, %v132_v38 }
 0x1d1   :  { %v128_v39 = vpop.xlane.xlu0 %127 }
 0x1d2   :  { %284 = vrcp.f32 %v128_v39 }
 0x1d5   :  { %v131_v40 = vpop.xlane.xlu1 %130 }
 0x1d6   :  { %286 = vrcp.f32 %v131_v40 }
 0x1df   :  { %v285_v41 = vpop.eup %284 }
 0x1e3   :  { %v287_v47 = vpop.eup %286 }
 0x20d   :  { %v171_v42 = vpop.f32.mrf.mxu0 }
 0x20e   :  { %v180_v44 = vmul.f32 %v285_v41, %v171_v42 }
 0x20f   :  { %v267_v45 = vpop.f32.mrf.mxu0 }
 0x210   :  { %v189_v46 = vadd.f32 %v254_v43, %v180_v44 }
 0x211   :  { %v174_v48 = vpop.f32.mrf.mxu0 }
 0x212   :  { %v181_v49 = vmul.f32 %v287_v47, %v174_v48  ;;  %191 = vadd.xlane.f32.xlu1 %v189_v46 }
 0x213   :  { %v268_v50 = vpop.f32.mrf.mxu0 }
 0x214   :  { %v190_v51 = vadd.f32 %v254_v43, %v181_v49 }
 0x216   :  { %193 = vadd.xlane.f32.xlu1 %v190_v51 }
 0x29b   :  { %v192_v54 = vpop.xlane.xlu1 %191 }
 0x29c   :  { %v195_v55 = vmul.f32 0.03125, %v192_v54 }
 0x29e   :  { %v197_v57 = vsub.f32 %v189_v46, %v195_v55 }
 0x29f   :  { %v194_v58 = vpop.xlane.xlu1 %193 }
 0x2a0   :  { %v196_v59 = vmul.f32 0.03125, %v194_v58  ;;  %v199_v60 = vmul.f32 %v251_v56, %v197_v57 }
 0x2a2   :  { %v198_v61 = vsub.f32 %v190_v51, %v196_v59  ;;  %v201_v62 = vmul.f32 %v199_v60, %v199_v60 }
 0x2a4   :  { %203 = vadd.xlane.f32.xlu1 %v201_v62  ;;  %v200_v63 = vmul.f32 %v251_v56, %v198_v61 }
 0x2a6   :  { %v202_v0 = vmul.f32 %v200_v63, %v200_v63 }
 0x2a8   :  { %205 = vadd.xlane.f32.xlu1 %v202_v0 }
 0x32d   :  { %v204_v1 = vpop.xlane.xlu1 %203 }
 0x32e   :  { %v207_v2 = vmul.f32 0.03125, %v204_v1 }
 0x330   :  { %v209_v3 = vadd.f32 1e-05, %v207_v2 }
 0x331   :  { %v206_v4 = vpop.xlane.xlu1 %205 }
 0x332   :  { %288 = vrsqrt.f32 %v209_v3  ;;  %v208_v5 = vmul.f32 0.03125, %v206_v4 }
 0x334   :  { %v210_v6 = vadd.f32 1e-05, %v208_v5 }
 0x336   :  { %290 = vrsqrt.f32 %v210_v6 }
 0x33f   :  { %v289_v7 = vpop.eup %288 }
 0x340   :  { %v213_v9 = vmul.f32 %v289_v7, %v199_v60 }
 0x342   :  { %v221_v11 = vmul.f32 %v255_v8, %v213_v9 }
 0x343   :  { %v291_v12 = vpop.eup %290 }
 0x344   :  { %v214_v13 = vmul.f32 %v291_v12, %v200_v63  ;;  %v229_v14 = vadd.f32 %v256_v10, %v221_v11 }
 0x346   :  { %v222_v15 = vmul.f32 %v255_v8, %v214_v13  ;;  %231 = vst [vmem:[#allocation8] sm:$0xff] %v229_v14 }
 0x348   :  { %v230_v16 = vadd.f32 %v256_v10, %v222_v15 }
 0x34a   :  { %232 = vst [vmem:[#allocation8 + $0x8] sm:$0xff] %v230_v16 }
 0x34b   :  { %363 = shalt.err (!%p360_p5)
}
 0x34c   :  { %244 = dma.vmem_to_hbm [thread:$0]  %s239_s22, 256, %s473_s7, [#allocation4], %s380_s9, %s380_s9, %s381_s10  }
 0x34d   :  { %376 = dma.done.wait [#allocation4], 256  }
 0x34e   :  { %377 = vsyncadd [#allocation4], 4294967040 }
 0x34f   :  { %248 = vsyncpa [#allocation3], 1 }
 0x350   :  { %249 = vsyncpa [#allocation6], 1 }
 0x351   :  { %250 = vsyncpa [#allocation4], 1 }

</bundles_post_ra>
